<compile_context>
chip_gen: v5e
topology: v5e:2x2
jax: 0.10.0
libtpu: 0.0.40
codegen_flags: <defaults>
</compile_context>

<pallas_src>
import jax
import jax.numpy as jnp
from jax import lax
from jax.experimental import pallas as pl
from jax.experimental.pallas import tpu as pltpu


# Problem geometry (fixed by the module: obs (B, 4, 75, 50) -> fc in = 384).
K = 5                    # conv kernel == stride
C_IN, C1, C2 = 4, 32, 64
H, W = 75, 50
H1, W1 = H // K, W // K          # 15, 10  (conv1 output spatial)
H2, W2 = H1 // K, W1 // K        # 3, 2    (conv2 output spatial)
NPATCH = K * K                   # 25  (kh, kw) positions feeding conv2
NOUT2 = H2 * W2                  # 6   conv2 spatial outputs per image
P1_K = C_IN * K * K              # 100 conv1 patch length
FC_IN, FC_OUT = C2 * NOUT2, 50   # 384, 50
LN_EPS = 1e-5

TB_MAX = 64                      # images per grid step (conv matmul M = 6*TB)


def _cdiv(a, b):
    return -(-a // b)


def _pick_tiling(B):
    """Number of batch tiles and tile size (multiple of 16 -> aligned bf16 tiles)."""
    ntiles = max(1, _cdiv(B, TB_MAX))
    tb = ((_cdiv(B, ntiles) + 15) // 16) * 16
    # Prefer >=2 grid steps (v7x has 2 TensorCores) when it costs no extra padding.
    if ntiles == 1 and tb >= 32 and tb % 32 == 0:
        ntiles, tb = 2, tb // 2
    return ntiles, tb


# ------------------------------ fused kernel --------------------------------

def _make_kernel(TB):
    R = NOUT2 * TB        # conv-stage rows per grid step, ordered (h2w2, batch)

    def kernel(p1_ref, w1_ref, b1_ref, w2_ref, b2_ref,
               wfc_ref, bfc_ref, g_ref, beta_ref, o_ref, acc_ref):
        # Weights / biases loaded once per grid step (VMEM-resident across steps).
        w1 = w1_ref[...]                        # (100, 32) bf16, 1/255 folded in
        b1 = b1_ref[...]                        # (1, 32)   f32

        # conv2 accumulator starts at its bias (saves a separate add later).
        acc_ref[...] = jnp.broadcast_to(b2_ref[...], (R, C2))

        # conv1 + conv2 fused over the 25 (kh, kw) patch positions.
        # fori_loop keeps xk / a1k live ranges bounded (body traced once).
        def body(k, carry):
            xk = p1_ref[k]                      # (6*TB, 100) bf16, aligned slab
            a1k = jnp.maximum(
                jnp.dot(xk, w1, preferred_element_type=jnp.float32) + b1, 0.0)
            acc_ref[...] += jnp.dot(a1k.astype(jnp.bfloat16), w2_ref[k],
                                    preferred_element_type=jnp.float32)
            return carry

        lax.fori_loop(0, NPATCH, body, None)

        a2 = jnp.maximum(acc_ref[...], 0.0).astype(jnp.bfloat16)   # (6*TB, 64)

        # fc (384 -> 50): 6 accumulated (TB,64)@(64,50) matmuls over contiguous
        # (TB, 64) row blocks (wfc rows pre-permuted to (h2w2, c) order).
        hfc = jnp.broadcast_to(bfc_ref[...], (TB, FC_OUT))          # f32
        for s in range(NOUT2):
            hfc = hfc + jnp.dot(a2[s * TB:(s + 1) * TB, :], wfc_ref[s],
                                preferred_element_type=jnp.float32)

        # LayerNorm(50) (biased variance, like torch), all in f32.
        mean = jnp.mean(hfc, axis=-1, keepdims=True)
        var = jnp.mean(jnp.square(hfc - mean), axis=-1, keepdims=True)
        normed = (hfc - mean) * lax.rsqrt(var + LN_EPS)
        o_ref[...] = normed * g_ref[...] + beta_ref[...]            # (TB, 50)

    return kernel


# ------------------------- one-time parameter prep --------------------------

def prepare_params(params):
    """Permute / scale weights once so the kernel needs no activation relayouts.

    Matmul operands are stored in bf16 (native MXU dtype on v5e/v6e/v7x);
    biases and the LayerNorm affine parameters stay f32.
    """
    # conv1: OIHW (32,4,5,5) -> (100, 32), rows ordered (c, i, j); fold 1/255.
    w1p = (params["w1"].astype(jnp.float32) / 255.0).reshape(C1, P1_K).T
    # conv2: OIHW (64,32,5,5) -> (25, 32, 64), leading axis = kh*5 + kw.
    w2p = params["w2"].astype(jnp.float32).transpose(2, 3, 1, 0).reshape(NPATCH, C1, C2)
    # fc: rows are NCHW flatten (c, h2, w2); permute to (h2w2, c) blocks of 64.
    wfcp = params["wfc"].astype(jnp.float32).reshape(C2, NOUT2, FC_OUT).transpose(1, 0, 2)
    return {
        "w1p": w1p.astype(jnp.bfloat16),                        # (100, 32)
        "b1": params["b1"].astype(jnp.float32).reshape(1, C1),
        "w2p": w2p.astype(jnp.bfloat16),                        # (25, 32, 64)
        "b2": params["b2"].astype(jnp.float32).reshape(1, C2),
        "wfcp": wfcp.astype(jnp.bfloat16),                      # (6, 64, 50)
        "bfc": params["bfc"].astype(jnp.float32).reshape(1, FC_OUT),
        "gamma": params["gamma"].astype(jnp.float32).reshape(1, FC_OUT),
        "beta": params["beta"].astype(jnp.float32).reshape(1, FC_OUT),
    }


# --------------------------- PixelEncoder forward ----------------------------

@jax.jit
def pixel_encoder_forward(obs, prep):
    """obs: (B, 4, 75, 50) NCHW pixels (uint8 values are exact in bf16).
    Returns (B, 50) float32."""
    B, C, Hh, Ww = obs.shape
    assert (C, Hh, Ww) == (C_IN, H, W)
    ntiles, TB = _pick_tiling(B)
    Bp = ntiles * TB

    # bf16 pixels: exact for 0..255 integers, halves patchify + kernel DMA traffic.
    x = obs.astype(jnp.bfloat16)
    if Bp != B:
        x = jnp.pad(x, ((0, Bp - B), (0, 0), (0, 0), (0, 0)))

    # Patchify (single XLA transpose of the raw input, unavoidable):
    # per-k rows are ordered (tile, h2w2, batch-in-tile), columns (c, i, j),
    # so each grid step's block is contiguous and each per-k slice is a
    # sublane-aligned (6*TB, 100) slab.
    p1 = x.reshape(ntiles, TB, C_IN, H2, K, K, W2, K, K)   # (g,b,c,h2,kh,i,w2,kw,j)
    p1 = p1.transpose(4, 7, 0, 3, 6, 1, 2, 5, 8)           # (kh,kw,g,h2,w2,b,c,i,j)
    p1 = p1.reshape(NPATCH, Bp * NOUT2, P1_K)              # (25, tiles*6*TB, 100)

    out = pl.pallas_call(
        _make_kernel(TB),
        out_shape=jax.ShapeDtypeStruct((Bp, FC_OUT), jnp.float32),
        grid=(ntiles,),
        in_specs=[
            pl.BlockSpec((NPATCH, NOUT2 * TB, P1_K), lambda g: (0, g, 0)),
            # weights / affine params: constant index maps -> VMEM-resident
            pl.BlockSpec((P1_K, C1), lambda g: (0, 0)),
            pl.BlockSpec((1, C1), lambda g: (0, 0)),
            pl.BlockSpec((NPATCH, C1, C2), lambda g: (0, 0, 0)),
            pl.BlockSpec((1, C2), lambda g: (0, 0)),
            pl.BlockSpec((NOUT2, C2, FC_OUT), lambda g: (0, 0, 0)),
            pl.BlockSpec((1, FC_OUT), lambda g: (0, 0)),
            pl.BlockSpec((1, FC_OUT), lambda g: (0, 0)),
            pl.BlockSpec((1, FC_OUT), lambda g: (0, 0)),
        ],
        out_specs=pl.BlockSpec((TB, FC_OUT), lambda g: (g, 0)),
        scratch_shapes=[pltpu.VMEM((NOUT2 * TB, C2), jnp.float32)],
        compiler_params=pltpu.CompilerParams(
            dimension_semantics=("parallel",)),
    )(p1, prep["w1p"], prep["b1"], prep["w2p"], prep["b2"],
      prep["wfcp"], prep["bfc"], prep["gamma"], prep["beta"])

    return out[:B]


# ------------------------------ pure-JAX reference ---------------------------

def pixel_encoder_reference(obs, params):
    x = obs.astype(jnp.float32) / 255.0
    y = lax.conv_general_dilated(x, params["w1"], (K, K), "VALID",
                                 dimension_numbers=("NCHW", "OIHW", "NCHW"))
    y = jax.nn.relu(y + params["b1"][None, :, None, None])
    y = lax.conv_general_dilated(y, params["w2"], (K, K), "VALID",
                                 dimension_numbers=("NCHW", "OIHW", "NCHW"))
    y = jax.nn.relu(y + params["b2"][None, :, None, None])
    h = y.reshape(y.shape[0], -1)                        # NCHW flatten, like .view
    hfc = h @ params["wfc"] + params["bfc"]
    mean = hfc.mean(-1, keepdims=True)
    var = ((hfc - mean) ** 2).mean(-1, keepdims=True)
    return (hfc - mean) / jnp.sqrt(var + LN_EPS) * params["gamma"] + params["beta"]


# ----------------------------------- main ------------------------------------

if __name__ == "__main__":
    key = jax.random.PRNGKey(0)
    k_obs1, k_obs2, k1, k2, k3, k4, k5, k6 = jax.random.split(key, 8)

    # Deterministic synthetic parameters (shapes from the module __init__).
    params = {
        "w1": 0.05 * jax.random.normal(k1, (32, 4, 5, 5), jnp.float32),   # Conv2d(4,32,5,s=5)
        "b1": 0.01 * jax.random.normal(k2, (32,), jnp.float32),
        "w2": 0.05 * jax.random.normal(k3, (64, 32, 5, 5), jnp.float32),  # Conv2d(32,64,5,s=5)
        "b2": 0.01 * jax.random.normal(k4, (64,), jnp.float32),
        "wfc": 0.05 * jax.random.normal(k5, (384, 50), jnp.float32),      # Linear(384,50)
        "bfc": 0.01 * jax.random.normal(k6, (50,), jnp.float32),
        "gamma": jnp.ones((50,), jnp.float32),                            # LayerNorm(50)
        "beta": jnp.zeros((50,), jnp.float32),
    }
    prep = prepare_params(params)   # one-time weight permutation / 1/255 fold / bf16 cast

    # Smallest shape consistent with fc input of 384: (B, 4, 75, 50) -> 64*3*2 = 384.
    # B=2 exercises the single-tile path; B=70 exercises multi-tile + batch padding.
    for k_obs, B in ((k_obs1, 2), (k_obs2, 70)):
        obs = jax.random.randint(k_obs, (B, C_IN, H, W), 0, 256,
                                 dtype=jnp.int32).astype(jnp.uint8)

        out = jax.block_until_ready(pixel_encoder_forward(obs, prep))
        assert out.shape == (B, FC_OUT) and out.dtype == jnp.float32

        ref = pixel_encoder_reference(obs, params)
        # bf16 MXU operands (with f32 accumulation) leave ~1e-2-scale deviations
        # on the unit-scale LayerNorm outputs vs. the pure-f32 reference.
        assert jnp.allclose(out, ref, atol=6e-2, rtol=6e-2), \
            f"mismatch vs JAX reference at B={B}"

    # TODO(synk): the module's `self.outputs` debug dict, the `detach` flag, and
    # copy_conv_weights_from / tie_weights (weight tying) are training-side
    # bookkeeping with no kernel equivalent; only the forward math is implemented.

    print("KERNEL_OK")
</pallas_src>

<mosaic_0001>
module attributes {stable_mosaic.version = 11 : i64} {
  func.func @kernel(%arg0: i32, %arg1: memref<25x96x100xbf16, #tpu.memory_space<vmem>>, %arg2: memref<100x32xbf16, #tpu.memory_space<vmem>>, %arg3: memref<1x32xf32, #tpu.memory_space<vmem>>, %arg4: memref<25x32x64xbf16, #tpu.memory_space<vmem>>, %arg5: memref<1x64xf32, #tpu.memory_space<vmem>>, %arg6: memref<6x64x50xbf16, #tpu.memory_space<vmem>>, %arg7: memref<1x50xf32, #tpu.memory_space<vmem>>, %arg8: memref<1x50xf32, #tpu.memory_space<vmem>>, %arg9: memref<1x50xf32, #tpu.memory_space<vmem>>, %arg10: memref<16x50xf32, #tpu.memory_space<vmem>>, %arg11: memref<96x64xf32, #tpu.memory_space<vmem>>) attributes {dimension_semantics = [#tpu.dimension_semantics<parallel>], iteration_bounds = array<i64: 1>, scalar_prefetch = 0 : i64, scratch_operands = 1 : i64, tpu.core_type = #tpu.core_type<tc>, window_params = [{transform_indices = @transform_0, window_bounds = array<i64: 25, 96, 100>}, {pipeline_mode = #tpu.pipeline_mode<synchronous>, transform_indices = @transform_1, window_bounds = array<i64: 100, 32>}, {pipeline_mode = #tpu.pipeline_mode<synchronous>, transform_indices = @transform_2, window_bounds = array<i64: 1, 32>}, {pipeline_mode = #tpu.pipeline_mode<synchronous>, transform_indices = @transform_3, window_bounds = array<i64: 25, 32, 64>}, {pipeline_mode = #tpu.pipeline_mode<synchronous>, transform_indices = @transform_4, window_bounds = array<i64: 1, 64>}, {pipeline_mode = #tpu.pipeline_mode<synchronous>, transform_indices = @transform_5, window_bounds = array<i64: 6, 64, 50>}, {pipeline_mode = #tpu.pipeline_mode<synchronous>, transform_indices = @transform_6, window_bounds = array<i64: 1, 50>}, {pipeline_mode = #tpu.pipeline_mode<synchronous>, transform_indices = @transform_7, window_bounds = array<i64: 1, 50>}, {pipeline_mode = #tpu.pipeline_mode<synchronous>, transform_indices = @transform_8, window_bounds = array<i64: 1, 50>}, {transform_indices = @transform_9, window_bounds = array<i64: 16, 50>}]} {
    %c0 = arith.constant 0 : index
    %c0_0 = arith.constant 0 : index
    %0 = vector.load %arg2[%c0, %c0_0] : memref<100x32xbf16, #tpu.memory_space<vmem>>, vector<100x32xbf16>
    %c0_1 = arith.constant 0 : index
    %c0_2 = arith.constant 0 : index
    %1 = vector.load %arg3[%c0_1, %c0_2] : memref<1x32xf32, #tpu.memory_space<vmem>>, vector<1x32xf32>
    %c0_3 = arith.constant 0 : index
    %c0_4 = arith.constant 0 : index
    %2 = vector.load %arg5[%c0_3, %c0_4] : memref<1x64xf32, #tpu.memory_space<vmem>>, vector<1x64xf32>
    %3 = vector.shape_cast %2 : vector<1x64xf32> to vector<1x64xf32>
    %4 = vector.broadcast %3 : vector<1x64xf32> to vector<96x64xf32>
    %c0_5 = arith.constant 0 : index
    %c0_6 = arith.constant 0 : index
    %5 = vector.load %arg11[%c0_5, %c0_6] : memref<96x64xf32, #tpu.memory_space<vmem>>, vector<96x64xf32>
    tpu.vector_store %arg11[%c0_5, %c0_6], %4 {strides = array<i32>} : memref<96x64xf32, #tpu.memory_space<vmem>>, vector<96x64xf32>,
    %c0_i32 = arith.constant 0 : i32
    %c25_i32 = arith.constant 25 : i32
    %6 = arith.addi %c0_i32, %c25_i32 : i32
    %c1_i32 = arith.constant 1 : i32
    scf.for %arg12 = %c0_i32 to %6 step %c1_i32  : i32 {
      %69 = arith.index_cast %arg12 : i32 to index
      %c0_42 = arith.constant 0 : index
      %c0_43 = arith.constant 0 : index
      %70 = vector.load %arg1[%69, %c0_42, %c0_43] : memref<25x96x100xbf16, #tpu.memory_space<vmem>>, vector<1x96x100xbf16>
      %71 = vector.shape_cast %70 : vector<1x96x100xbf16> to vector<96x100xbf16>
      %cst_44 = arith.constant dense<0.000000e+00> : vector<96x32xf32>
      %72 = tpu.matmul %71, %0, %cst_44 {dimension_numbers = #tpu.dot_dimension_numbers<[1], [0], [0], [1], [0, 0, 1, 1], [], []>} : vector<96x100xbf16>, vector<100x32xbf16>, vector<96x32xf32> -> vector<96x32xf32>
      %73 = vector.broadcast %1 : vector<1x32xf32> to vector<96x32xf32>
      %74 = arith.addf %72, %73 : vector<96x32xf32>
      %cst_45 = arith.constant 0.000000e+00 : f32
      %75 = vector.broadcast %cst_45 : f32 to vector<96x32xf32>
      %76 = arith.maximumf %74, %75 : vector<96x32xf32>
      %c0_46 = arith.constant 0 : index
      %c0_47 = arith.constant 0 : index
      %77 = vector.load %arg11[%c0_46, %c0_47] : memref<96x64xf32, #tpu.memory_space<vmem>>, vector<96x64xf32>
      %78 = arith.truncf %76 : vector<96x32xf32> to vector<96x32xbf16>
      %79 = arith.index_cast %arg12 : i32 to index
      %c0_48 = arith.constant 0 : index
      %c0_49 = arith.constant 0 : index
      %80 = vector.load %arg4[%79, %c0_48, %c0_49] : memref<25x32x64xbf16, #tpu.memory_space<vmem>>, vector<1x32x64xbf16>
      %81 = vector.shape_cast %80 : vector<1x32x64xbf16> to vector<32x64xbf16>
      %cst_50 = arith.constant dense<0.000000e+00> : vector<96x64xf32>
      %82 = tpu.matmul %78, %81, %cst_50 {dimension_numbers = #tpu.dot_dimension_numbers<[1], [0], [0], [1], [0, 0, 1, 1], [], []>} : vector<96x32xbf16>, vector<32x64xbf16>, vector<96x64xf32> -> vector<96x64xf32>
      %83 = arith.addf %77, %82 : vector<96x64xf32>
      %c0_51 = arith.constant 0 : index
      %c0_52 = arith.constant 0 : index
      %84 = vector.load %arg11[%c0_51, %c0_52] : memref<96x64xf32, #tpu.memory_space<vmem>>, vector<96x64xf32>
      tpu.vector_store %arg11[%c0_51, %c0_52], %83 {strides = array<i32>} : memref<96x64xf32, #tpu.memory_space<vmem>>, vector<96x64xf32>,
    }
    %c25_i32_7 = arith.constant 25 : i32
    %c0_8 = arith.constant 0 : index
    %c0_9 = arith.constant 0 : index
    %7 = vector.load %arg11[%c0_8, %c0_9] : memref<96x64xf32, #tpu.memory_space<vmem>>, vector<96x64xf32>
    %cst = arith.constant 0.000000e+00 : f32
    %8 = vector.broadcast %cst : f32 to vector<96x64xf32>
    %9 = arith.maximumf %7, %8 : vector<96x64xf32>
    %10 = arith.truncf %9 : vector<96x64xf32> to vector<96x64xbf16>
    %c0_10 = arith.constant 0 : index
    %c0_11 = arith.constant 0 : index
    %11 = vector.load %arg7[%c0_10, %c0_11] : memref<1x50xf32, #tpu.memory_space<vmem>>, vector<1x50xf32>
    %12 = vector.shape_cast %11 : vector<1x50xf32> to vector<1x50xf32>
    %13 = vector.broadcast %12 : vector<1x50xf32> to vector<16x50xf32>
    %14 = vector.extract_strided_slice %10 {offsets = [0, 0], sizes = [16, 64], strides = [1, 1]} : vector<96x64xbf16> to vector<16x64xbf16>
    %c0_12 = arith.constant 0 : index
    %c0_13 = arith.constant 0 : index
    %c0_14 = arith.constant 0 : index
    %15 = vector.load %arg6[%c0_12, %c0_13, %c0_14] : memref<6x64x50xbf16, #tpu.memory_space<vmem>>, vector<1x64x50xbf16>
    %16 = vector.shape_cast %15 : vector<1x64x50xbf16> to vector<64x50xbf16>
    %cst_15 = arith.constant dense<0.000000e+00> : vector<16x50xf32>
    %17 = tpu.matmul %14, %16, %cst_15 {dimension_numbers = #tpu.dot_dimension_numbers<[1], [0], [0], [1], [0, 0, 1, 1], [], []>} : vector<16x64xbf16>, vector<64x50xbf16>, vector<16x50xf32> -> vector<16x50xf32>
    %18 = arith.addf %13, %17 : vector<16x50xf32>
    %19 = vector.extract_strided_slice %10 {offsets = [16, 0], sizes = [16, 64], strides = [1, 1]} : vector<96x64xbf16> to vector<16x64xbf16>
    %c1 = arith.constant 1 : index
    %c0_16 = arith.constant 0 : index
    %c0_17 = arith.constant 0 : index
    %20 = vector.load %arg6[%c1, %c0_16, %c0_17] : memref<6x64x50xbf16, #tpu.memory_space<vmem>>, vector<1x64x50xbf16>
    %21 = vector.shape_cast %20 : vector<1x64x50xbf16> to vector<64x50xbf16>
    %cst_18 = arith.constant dense<0.000000e+00> : vector<16x50xf32>
    %22 = tpu.matmul %19, %21, %cst_18 {dimension_numbers = #tpu.dot_dimension_numbers<[1], [0], [0], [1], [0, 0, 1, 1], [], []>} : vector<16x64xbf16>, vector<64x50xbf16>, vector<16x50xf32> -> vector<16x50xf32>
    %23 = arith.addf %18, %22 : vector<16x50xf32>
    %24 = vector.extract_strided_slice %10 {offsets = [32, 0], sizes = [16, 64], strides = [1, 1]} : vector<96x64xbf16> to vector<16x64xbf16>
    %c2 = arith.constant 2 : index
    %c0_19 = arith.constant 0 : index
    %c0_20 = arith.constant 0 : index
    %25 = vector.load %arg6[%c2, %c0_19, %c0_20] : memref<6x64x50xbf16, #tpu.memory_space<vmem>>, vector<1x64x50xbf16>
    %26 = vector.shape_cast %25 : vector<1x64x50xbf16> to vector<64x50xbf16>
    %cst_21 = arith.constant dense<0.000000e+00> : vector<16x50xf32>
    %27 = tpu.matmul %24, %26, %cst_21 {dimension_numbers = #tpu.dot_dimension_numbers<[1], [0], [0], [1], [0, 0, 1, 1], [], []>} : vector<16x64xbf16>, vector<64x50xbf16>, vector<16x50xf32> -> vector<16x50xf32>
    %28 = arith.addf %23, %27 : vector<16x50xf32>
    %29 = vector.extract_strided_slice %10 {offsets = [48, 0], sizes = [16, 64], strides = [1, 1]} : vector<96x64xbf16> to vector<16x64xbf16>
    %c3 = arith.constant 3 : index
    %c0_22 = arith.constant 0 : index
    %c0_23 = arith.constant 0 : index
    %30 = vector.load %arg6[%c3, %c0_22, %c0_23] : memref<6x64x50xbf16, #tpu.memory_space<vmem>>, vector<1x64x50xbf16>
    %31 = vector.shape_cast %30 : vector<1x64x50xbf16> to vector<64x50xbf16>
    %cst_24 = arith.constant dense<0.000000e+00> : vector<16x50xf32>
    %32 = tpu.matmul %29, %31, %cst_24 {dimension_numbers = #tpu.dot_dimension_numbers<[1], [0], [0], [1], [0, 0, 1, 1], [], []>} : vector<16x64xbf16>, vector<64x50xbf16>, vector<16x50xf32> -> vector<16x50xf32>
    %33 = arith.addf %28, %32 : vector<16x50xf32>
    %34 = vector.extract_strided_slice %10 {offsets = [64, 0], sizes = [16, 64], strides = [1, 1]} : vector<96x64xbf16> to vector<16x64xbf16>
    %c4 = arith.constant 4 : index
    %c0_25 = arith.constant 0 : index
    %c0_26 = arith.constant 0 : index
    %35 = vector.load %arg6[%c4, %c0_25, %c0_26] : memref<6x64x50xbf16, #tpu.memory_space<vmem>>, vector<1x64x50xbf16>
    %36 = vector.shape_cast %35 : vector<1x64x50xbf16> to vector<64x50xbf16>
    %cst_27 = arith.constant dense<0.000000e+00> : vector<16x50xf32>
    %37 = tpu.matmul %34, %36, %cst_27 {dimension_numbers = #tpu.dot_dimension_numbers<[1], [0], [0], [1], [0, 0, 1, 1], [], []>} : vector<16x64xbf16>, vector<64x50xbf16>, vector<16x50xf32> -> vector<16x50xf32>
    %38 = arith.addf %33, %37 : vector<16x50xf32>
    %39 = vector.extract_strided_slice %10 {offsets = [80, 0], sizes = [16, 64], strides = [1, 1]} : vector<96x64xbf16> to vector<16x64xbf16>
    %c5 = arith.constant 5 : index
    %c0_28 = arith.constant 0 : index
    %c0_29 = arith.constant 0 : index
    %40 = vector.load %arg6[%c5, %c0_28, %c0_29] : memref<6x64x50xbf16, #tpu.memory_space<vmem>>, vector<1x64x50xbf16>
    %41 = vector.shape_cast %40 : vector<1x64x50xbf16> to vector<64x50xbf16>
    %cst_30 = arith.constant dense<0.000000e+00> : vector<16x50xf32>
    %42 = tpu.matmul %39, %41, %cst_30 {dimension_numbers = #tpu.dot_dimension_numbers<[1], [0], [0], [1], [0, 0, 1, 1], [], []>} : vector<16x64xbf16>, vector<64x50xbf16>, vector<16x50xf32> -> vector<16x50xf32>
    %43 = arith.addf %38, %42 : vector<16x50xf32>
    %cst_31 = arith.constant dense<0.000000e+00> : vector<16xf32>
    %44 = vector.multi_reduction <add>, %43, %cst_31 [1] : vector<16x50xf32> to vector<16xf32>
    %45 = vector.shape_cast %44 : vector<16xf32> to vector<16x1xf32>
    %cst_32 = arith.constant 5.000000e+01 : f32
    %46 = vector.broadcast %cst_32 : f32 to vector<16x1xf32>
    %47 = arith.divf %45, %46 : vector<16x1xf32>
    %48 = vector.broadcast %47 : vector<16x1xf32> to vector<16x50xf32>
    %49 = arith.subf %43, %48 : vector<16x50xf32>
    %50 = arith.mulf %49, %49 : vector<16x50xf32>
    %cst_33 = arith.constant dense<0.000000e+00> : vector<16xf32>
    %51 = vector.multi_reduction <add>, %50, %cst_33 [1] : vector<16x50xf32> to vector<16xf32>
    %52 = vector.shape_cast %51 : vector<16xf32> to vector<16x1xf32>
    %cst_34 = arith.constant 5.000000e+01 : f32
    %53 = vector.broadcast %cst_34 : f32 to vector<16x1xf32>
    %54 = arith.divf %52, %53 : vector<16x1xf32>
    %55 = vector.broadcast %47 : vector<16x1xf32> to vector<16x50xf32>
    %56 = arith.subf %43, %55 : vector<16x50xf32>
    %cst_35 = arith.constant 9.99999974E-6 : f32
    %57 = vector.broadcast %cst_35 : f32 to vector<16x1xf32>
    %58 = arith.addf %54, %57 : vector<16x1xf32>
    %59 = math.rsqrt %58 : vector<16x1xf32>
    %60 = vector.broadcast %59 : vector<16x1xf32> to vector<16x50xf32>
    %61 = arith.mulf %56, %60 : vector<16x50xf32>
    %c0_36 = arith.constant 0 : index
    %c0_37 = arith.constant 0 : index
    %62 = vector.load %arg8[%c0_36, %c0_37] : memref<1x50xf32, #tpu.memory_space<vmem>>, vector<1x50xf32>
    %63 = vector.broadcast %62 : vector<1x50xf32> to vector<16x50xf32>
    %64 = arith.mulf %61, %63 : vector<16x50xf32>
    %c0_38 = arith.constant 0 : index
    %c0_39 = arith.constant 0 : index
    %65 = vector.load %arg9[%c0_38, %c0_39] : memref<1x50xf32, #tpu.memory_space<vmem>>, vector<1x50xf32>
    %66 = vector.broadcast %65 : vector<1x50xf32> to vector<16x50xf32>
    %67 = arith.addf %64, %66 : vector<16x50xf32>
    %c0_40 = arith.constant 0 : index
    %c0_41 = arith.constant 0 : index
    %68 = vector.load %arg10[%c0_40, %c0_41] : memref<16x50xf32, #tpu.memory_space<vmem>>, vector<16x50xf32>
    tpu.vector_store %arg10[%c0_40, %c0_41], %67 {strides = array<i32>} : memref<16x50xf32, #tpu.memory_space<vmem>>, vector<16x50xf32>,
    return
  }
  func.func @transform_0(%arg0: i32) -> (i32, i32, i32) {
    %c0_i32 = arith.constant 0 : i32
    %c0_i32_0 = arith.constant 0 : i32
    %c0_i32_1 = arith.constant 0 : i32
    return %c0_i32, %arg0, %c0_i32_0 : i32, i32, i32
  }
  func.func @transform_1(%arg0: i32) -> (i32, i32) {
    %c0_i32 = arith.constant 0 : i32
    %c0_i32_0 = arith.constant 0 : i32
    %c0_i32_1 = arith.constant 0 : i32
    return %c0_i32, %c0_i32_0 : i32, i32
  }
  func.func @transform_2(%arg0: i32) -> (i32, i32) {
    %c0_i32 = arith.constant 0 : i32
    %c0_i32_0 = arith.constant 0 : i32
    %c0_i32_1 = arith.constant 0 : i32
    return %c0_i32, %c0_i32_0 : i32, i32
  }
  func.func @transform_3(%arg0: i32) -> (i32, i32, i32) {
    %c0_i32 = arith.constant 0 : i32
    %c0_i32_0 = arith.constant 0 : i32
    %c0_i32_1 = arith.constant 0 : i32
    %c0_i32_2 = arith.constant 0 : i32
    return %c0_i32, %c0_i32_0, %c0_i32_1 : i32, i32, i32
  }
  func.func @transform_4(%arg0: i32) -> (i32, i32) {
    %c0_i32 = arith.constant 0 : i32
    %c0_i32_0 = arith.constant 0 : i32
    %c0_i32_1 = arith.constant 0 : i32
    return %c0_i32, %c0_i32_0 : i32, i32
  }
  func.func @transform_5(%arg0: i32) -> (i32, i32, i32) {
    %c0_i32 = arith.constant 0 : i32
    %c0_i32_0 = arith.constant 0 : i32
    %c0_i32_1 = arith.constant 0 : i32
    %c0_i32_2 = arith.constant 0 : i32
    return %c0_i32, %c0_i32_0, %c0_i32_1 : i32, i32, i32
  }
  func.func @transform_6(%arg0: i32) -> (i32, i32) {
    %c0_i32 = arith.constant 0 : i32
    %c0_i32_0 = arith.constant 0 : i32
    %c0_i32_1 = arith.constant 0 : i32
    return %c0_i32, %c0_i32_0 : i32, i32
  }
  func.func @transform_7(%arg0: i32) -> (i32, i32) {
    %c0_i32 = arith.constant 0 : i32
    %c0_i32_0 = arith.constant 0 : i32
    %c0_i32_1 = arith.constant 0 : i32
    return %c0_i32, %c0_i32_0 : i32, i32
  }
  func.func @transform_8(%arg0: i32) -> (i32, i32) {
    %c0_i32 = arith.constant 0 : i32
    %c0_i32_0 = arith.constant 0 : i32
    %c0_i32_1 = arith.constant 0 : i32
    return %c0_i32, %c0_i32_0 : i32, i32
  }
  func.func @transform_9(%arg0: i32) -> (i32, i32) {
    %c0_i32 = arith.constant 0 : i32
    %c0_i32_0 = arith.constant 0 : i32
    return %arg0, %c0_i32 : i32, i32
  }
}

</mosaic_0001>

<bundles_post_ra>
// kernel: pixel_encoder_forward.1
= control target key start
LH: loop header
LB: loop body
LE: loop exit
PB: predicated region body
PF: predicated region fallthrough
CT: control target
= control target key end

     0   :  { %vm51_vm0 = vcmask 523264   ;;  %s1382_s0 = inlined_call_operand.vmem [shape: bf16[25,96,100], index: 0, kind: input, shape index: {}]   ;;  %s1383_s1 = inlined_call_operand.vmem [shape: bf16[100,32], index: 1, kind: input, shape index: {}]   ;;  %s1384_s3 = inlined_call_operand.vmem [shape: bf16[25,32,64], index: 3, kind: input, shape index: {}]   ;;  %s1385_s5 = inlined_call_operand.vmem [shape: bf16[6,64,50], index: 5, kind: input, shape index: {}]   ;;  %s1386_s6 = inlined_call_operand.vmem [shape: f32[1,50], index: 6, kind: input, shape index: {}]   ;;  %s1387_s7 = inlined_call_operand.vmem [shape: f32[1,50], index: 7, kind: input, shape index: {}]   ;;  %s1388_s8 = inlined_call_operand.vmem [shape: f32[1,50], index: 8, kind: input, shape index: {}]   ;;  %s1389_s9 = inlined_call_operand.vmem [shape: f32[16,50], index: 9, kind: output, shape index: {}]   ;;  %s1390_s2 = inlined_call_operand.vmem [shape: f32[1,32], index: 2, kind: input, shape index: {}]   ;;  %s1391_s4 = inlined_call_operand.vmem [shape: f32[1,64], index: 4, kind: input, shape index: {}]  }
   0x1   :  { %v1153_v0 = vld [vmem:[%s1383_s1] sm:$0xf]  ;;  %v1158_v1 = vld [vmem:[%s1383_s1] sm:$0xf0]  ;;  %v1163_v2 = vld [vmem:[%s1383_s1 + $0x8] sm:$0xf] }
   0x2   :  { %v1168_v3 = vld [vmem:[%s1383_s1 + $0x8] sm:$0xf0]  ;;  %v1173_v4 = vld [vmem:[%s1383_s1 + $0x10] sm:$0xf]  ;;  %v1178_v5 = vld [vmem:[%s1383_s1 + $0x10] sm:$0xf0] }
   0x3   :  { %v1183_v6 = vld [vmem:[%s1383_s1 + $0x18] sm:$0xf]  ;;  %v1188_v7 = vld [vmem:[%s1383_s1 + $0x18] sm:$0xf0]  ;;  %v1193_v8 = vld [vmem:[%s1383_s1 + $0x20] sm:$0xf] }
   0x4   :  { %v1198_v9 = vld [vmem:[%s1383_s1 + $0x20] sm:$0xf0]  ;;  %v1203_v10 = vld [vmem:[%s1383_s1 + $0x28] sm:$0xf]  ;;  %v1208_v11 = vld [vmem:[%s1383_s1 + $0x28] sm:$0xf0] }
   0x5   :  { %v1213_v12 = vld [vmem:[%s1383_s1 + $0x30] sm:$0x3]  ;;  %v1218_v13 = vld [vmem:[%s1390_s2] sm:$0x1]  ;;  %s1235_s1 = smov 0  }
   0x6   :  { %v1081_v14 = vld [vmem:[%s1391_s4] ss:$0 sm:$0xff] }
   0x7   :  { %52 = vst.msk [vmem:[#allocation2] sm:$0xff] %vm51_vm0, %v1081_v14 }
   0x8   :  { %53 = vst.msk [vmem:[#allocation2 + $0x8] sm:$0xff] %vm51_vm0, %v1081_v14 }
   0x9   :  { %54 = vst.msk [vmem:[#allocation2 + $0x10] sm:$0xff] %vm51_vm0, %v1081_v14 }
   0xa   :  { %55 = vst.msk [vmem:[#allocation2 + $0x18] sm:$0xff] %vm51_vm0, %v1081_v14 }
   0xb   :  { %56 = vst.msk [vmem:[#allocation2 + $0x20] sm:$0xff] %vm51_vm0, %v1081_v14 }
   0xc   :  { %57 = vst.msk [vmem:[#allocation2 + $0x28] sm:$0xff] %vm51_vm0, %v1081_v14 }
   0xd   :  { %58 = vst.msk [vmem:[#allocation2 + $0x30] sm:$0xff] %vm51_vm0, %v1081_v14 }
   0xe   :  { %59 = vst.msk [vmem:[#allocation2 + $0x38] sm:$0xff] %vm51_vm0, %v1081_v14 }
   0xf   :  { %60 = vst.msk [vmem:[#allocation2 + $0x40] sm:$0xff] %vm51_vm0, %v1081_v14 }
  0x10   :  { %61 = vst.msk [vmem:[#allocation2 + $0x48] sm:$0xff] %vm51_vm0, %v1081_v14 }
  0x11   :  { %62 = vst.msk [vmem:[#allocation2 + $0x50] sm:$0xff] %vm51_vm0, %v1081_v14 }
  0x12   :  { %63 = vst.msk [vmem:[#allocation2 + $0x58] sm:$0xff] %vm51_vm0, %v1081_v14 }
  0x13 LB: > { %v143_v15 = vunpack.c.l.b16 %v1213_v12  ;;  %vm176_vm1 = vcmask 1041408   ;;  %v858_v18 = vor.u32 %v1208_v11, %v1203_v10  ;;  %v854_v19 = vor.u32 %v1198_v9, %v1193_v8  ;;  %s1029_s2 = smul.u32 48, %s1097_s1  ;;  %s1036_s20 = sshll.u32 %s1097_s1, 4  ;;  %s1097_s1 = sphi %s1235_s1, %s69_s1  }
  0x14   : > { %v850_v20 = vor.u32 %v1188_v7, %v1183_v6  ;;  %v846_v21 = vor.u32 %v1178_v5, %v1173_v4  ;;  %v842_v22 = vor.u32 %v1168_v3, %v1163_v2  ;;  %v838_v23 = vor.u32 %v1158_v1, %v1153_v0  ;;  %s251_s23 = scalar_lea.vmem %s1384_s3, %s1036_s20  ;;  %s69_s1 = sadd.s32 1, %s1097_s1  }
  0x15   : > { %v150_v16 = vpack.c.b16 %v143_v15, %v143_v15  ;;  %s72_s19 = scalar_lea.vmem %s1382_s0, %s1029_s2  ;;  %vm157_vm2 = vcmask 818176   ;;  %v1038_v30 = vld [vmem:[%s251_s23 + $0x8] sm:$0xff]  ;;  %v1037_v31 = vld [vmem:[%s251_s23] sm:$0xff]  ;;  %v86_v33 = vperm.slane %v1218_v13, 0  ;;  %vm268_vm3 = vcmask 261120   ;;  %p66_p0 = scmp.ge.s32.totalorder %s69_s1, 25  }
  0x16   : > { %v1030_v24 = vld [vmem:[%s72_s19] sm:$0xff]  ;;  %v1033_v25 = vld [vmem:[%s72_s19 + $0x18] sm:$0xff]  ;;  %v1031_v26 = vld [vmem:[%s72_s19 + $0x8] sm:$0xff]  ;;  %293 = vmatpush.bf16.msra.mxu1 %v1038_v30  ;;  %1070 = vmatpush.bf16.msra.mxu3 %v1038_v30  ;;  %vm731_vm4 = vcmask (%p66_p0), 408576  }
  0x17   : > { %v178_v17 = vsel %vm176_vm1, %v150_v16, 0  ;;  %v1034_v27 = vld [vmem:[%s72_s19 + $0x20] sm:$0xff]  ;;  %v1032_v28 = vld [vmem:[%s72_s19 + $0x10] sm:$0xff]  ;;  %v1035_v29 = vld [vmem:[%s72_s19 + $0x28] sm:$0xff] }
  0x18   : > { %181 = vmatpush.bf16.msra.mxu0 %v178_v17  ;;  %1063 = vmatpush.bf16.msra.mxu2 %v178_v17  ;;  %v1041_v0 = vld [vmem:[%s1385_s5 + $0x10] sm:$0xff] (%p66_p0)  ;;  %v1040_v4 = vld [vmem:[%s1385_s5 + $0x8] sm:$0xff] (%p66_p0) }
  0x19   :  { %v1045_v1 = vld [vmem:[%s1385_s5 + $0x30] sm:$0xff] (%p66_p0)  ;;  %v1044_v5 = vld [vmem:[%s1385_s5 + $0x28] sm:$0xff] (%p66_p0) }
  0x1a   : > { %294 = vmatpush.bf16.msra.mxu1 %v1037_v31  ;;  %1071 = vmatpush.bf16.msra.mxu3 %v1037_v31  ;;  %v233_v31 = vld [vmem:[#allocation2 + $0x10] sm:$0xff]  ;;  %v1048_v6 = vld [vmem:[%s1385_s5 + $0x48] sm:$0xff] (%p66_p0) }
  0x1b   :  { %v1049_v2 = vld [vmem:[%s1385_s5 + $0x50] sm:$0xff] (%p66_p0)  ;;  %v1052_v7 = vld [vmem:[%s1385_s5 + $0x68] sm:$0xff] (%p66_p0) }
  0x1c   : > { %182 = vmatpush.bf16.msra.mxu0 %v858_v18  ;;  %1064 = vmatpush.bf16.msra.mxu2 %v858_v18  ;;  %v1053_v3 = vld [vmem:[%s1385_s5 + $0x70] sm:$0xff] (%p66_p0) }
  0x20   : > { %183 = vmatpush.bf16.msra.mxu0 %v854_v19  ;;  %1065 = vmatpush.bf16.msra.mxu2 %v854_v19 }
  0x24   : > { %184 = vmatpush.bf16.msra.mxu0 %v850_v20  ;;  %1066 = vmatpush.bf16.msra.mxu2 %v850_v20 }
  0x28   : > { %185 = vmatpush.bf16.msra.mxu0 %v846_v21  ;;  %1067 = vmatpush.bf16.msra.mxu2 %v846_v21 }
  0x2c   : > { %186 = vmatpush.bf16.msra.mxu0 %v842_v22  ;;  %1068 = vmatpush.bf16.msra.mxu2 %v842_v22 }
  0x30   : > { %187 = vmatpush.bf16.msra.mxu0 %v838_v23  ;;  %1069 = vmatpush.bf16.msra.mxu2 %v838_v23 }
  0x33   : > { %859 = vmatmul.msk.bf16.vlgmr.msra.gmra.mxu0 %vm157_vm2, %v1030_v24  ;;  %862 = vmatmul.msk.bf16.vlgmr.msra.gmra.mxu2 %vm157_vm2, %v1033_v25  ;;  %v231_v25 = vld [vmem:[#allocation2] sm:$0xff] }
  0x43   : > { %860 = vmatmul.msk.bf16.gmra.mxu0 %vm157_vm2, %v1031_v26  ;;  %863 = vmatmul.msk.bf16.gmra.mxu2 %vm157_vm2, %v1034_v27 }
  0x53   : > { %861 = vmatmul.msk.bf16.gmra.mxu0 %vm157_vm2, %v1032_v28  ;;  %864 = vmatmul.msk.bf16.gmra.mxu2 %vm157_vm2, %v1035_v29  ;;  %v232_v28 = vld [vmem:[#allocation2 + $0x8] sm:$0xff] }
  0xb0   : > { %v189_v32 = vpop.f32.mrf.mxu0 }
  0xb1   : > { %v190_v35 = vadd.f32 %v189_v32, %v86_v33 }
  0xb3   : > { %v219_v38 = vmax.f32 %v190_v35, 0.0 }
  0xb6   : > { %v204_v34 = vpop.f32.mrf.mxu2 }
  0xb7   : > { %v205_v21 = vadd.f32 %v204_v34, %v86_v33 }
  0xb8   : > { %v191_v36 = vpop.f32.mrf.mxu0 }
  0xb9   : > { %v192_v37 = vadd.f32 %v191_v36, %v86_v33  ;;  %v225_v23 = vmax.f32 %v205_v21, 0.0 }
  0xbb   : > { %v220_v39 = vmax.f32 %v192_v37, 0.0  ;;  %v239_v37 = vld [vmem:[#allocation2 + $0x40] sm:$0xff] }
  0xbd   : > { %v243_v40 = vpack.c.bf16 %v220_v39, %v219_v38 }
  0xbe   : > { %v206_v41 = vpop.f32.mrf.mxu2 }
  0xbf   : > { %875 = vmatmul.msk.bf16.vlgmr.msra.gmra.mxu1 %vm268_vm3, %v243_v40  ;;  %v207_v20 = vadd.f32 %v206_v41, %v86_v33  ;;  %v235_v40 = vld [vmem:[#allocation2 + $0x20] sm:$0xff] }
  0xc0   : > { %v194_v42 = vpop.f32.mrf.mxu0 }
  0xc1   : > { %v195_v44 = vadd.f32 %v194_v42, %v86_v33  ;;  %v226_v22 = vmax.f32 %v207_v20, 0.0 }
  0xc3   : > { %v221_v47 = vmax.f32 %v195_v44, 0.0  ;;  %v246_v24 = vpack.c.bf16 %v226_v22, %v225_v23 }
  0xc6   : > { %v209_v43 = vpop.f32.mrf.mxu2 }
  0xc7   : > { %v210_v49 = vadd.f32 %v209_v43, %v86_v33  ;;  %v240_v43 = vld [vmem:[#allocation2 + $0x48] sm:$0xff] }
  0xc8   : > { %v196_v45 = vpop.f32.mrf.mxu0 }
  0xc9   : > { %v197_v46 = vadd.f32 %v196_v45, %v86_v33  ;;  %v227_v54 = vmax.f32 %v210_v49, 0.0  ;;  %v241_v49 = vld [vmem:[#allocation2 + $0x50] sm:$0xff] }
  0xcb   : > { %v222_v48 = vmax.f32 %v197_v46, 0.0  ;;  %v236_v46 = vld [vmem:[#allocation2 + $0x28] sm:$0xff] }
  0xcd   : > { %v244_v50 = vpack.c.bf16 %v222_v48, %v221_v47 }
  0xce   : > { %v211_v51 = vpop.f32.mrf.mxu2 }
  0xcf   : > { %v212_v52 = vadd.f32 %v211_v51, %v86_v33  ;;  %876 = vmatmul.msk.bf16.gmra.mxu1 %vm268_vm3, %v244_v50 }
  0xd0   : > { %v199_v53 = vpop.f32.mrf.mxu0 }
  0xd1   : > { %v228_v55 = vmax.f32 %v212_v52, 0.0  ;;  %v200_v58 = vadd.f32 %v199_v53, %v86_v33  ;;  %v237_v52 = vld [vmem:[#allocation2 + $0x30] sm:$0xff] }
  0xd3   : > { %v247_v56 = vpack.c.bf16 %v228_v55, %v227_v54  ;;  %v223_v61 = vmax.f32 %v200_v58, 0.0  ;;  %v242_v55 = vld [vmem:[#allocation2 + $0x58] sm:$0xff] }
  0xd4   : > { %v238_v58 = vld [vmem:[#allocation2 + $0x38] sm:$0xff] }
  0xd5   : > { %879 = vmatmul.msk.bf16.vlgmr.msra.gmra.mxu3 %vm268_vm3, %v247_v56 }
  0xd6   : > { %v214_v57 = vpop.f32.mrf.mxu2 }
  0xd7   : > { %v215_v63 = vadd.f32 %v214_v57, %v86_v33 }
  0xd8   : > { %v201_v59 = vpop.f32.mrf.mxu0 }
  0xd9   : > { %v202_v60 = vadd.f32 %v201_v59, %v86_v33  ;;  %v229_v17 = vmax.f32 %v215_v63, 0.0  ;;  %v1050_v63 = vld [vmem:[%s1385_s5 + $0x58] sm:$0xff] (%p66_p0) }
  0xda   :  { %548 = vmatpush.bf16.msra.mxu2 (%p66_p0), %v1050_v63 }
  0xdb   : > { %v224_v62 = vmax.f32 %v202_v60, 0.0 }
  0xdd   : > { %v245_v14 = vpack.c.bf16 %v224_v62, %v223_v61  ;;  %v1042_v61 = vld [vmem:[%s1385_s5 + $0x18] sm:$0xff] (%p66_p0) }
  0xde   : > { %v216_v15 = vpop.f32.mrf.mxu2  ;;  %v1046_v62 = vld [vmem:[%s1385_s5 + $0x38] sm:$0xff] (%p66_p0)  ;;  %434 = vmatpush.bf16.msra.mxu0 (%p66_p0), %v1042_v61  ;;  %549 = vmatpush.bf16.msra.mxu2 (%p66_p0), %v1049_v2  ;;  %v1056_v61 = vld [vmem:[%s1385_s5 + $0x88] sm:$0xff] (%p66_p0)  ;;  %v1055_v2 = vld [vmem:[%s1385_s5 + $0x80] sm:$0xff] (%p66_p0) }
  0xdf   : > { %v217_v16 = vadd.f32 %v216_v15, %v86_v33  ;;  %877 = vmatmul.msk.bf16.gmra.mxu1 %vm268_vm3, %v245_v14  ;;  %v234_v33 = vld [vmem:[#allocation2 + $0x18] sm:$0xff] }
  0xe0   :  { %v1054_v14 = vld [vmem:[%s1385_s5 + $0x78] sm:$0xff] (%p66_p0)  ;;  %491 = vmatpush.bf16.msra.mxu1 (%p66_p0), %v1046_v62  ;;  %v1060_v62 = vld [vmem:[%s1385_s5 + $0xa8] sm:$0xff] (%p66_p0) }
  0xe1   : > { %v230_v18 = vmax.f32 %v217_v16, 0.0  ;;  %605 = vmatpush.bf16.msra.mxu3 (%p66_p0), %v1054_v14 }
  0xe2   :  { %435 = vmatpush.bf16.msra.mxu0 (%p66_p0), %v1041_v0  ;;  %550 = vmatpush.bf16.msra.mxu2 (%p66_p0), %v1048_v6 }
  0xe3   : > { %v248_v19 = vpack.c.bf16 %v230_v18, %v229_v17 }
  0xe4   :  { %492 = vmatpush.bf16.msra.mxu1 (%p66_p0), %v1045_v1 }
  0xe5   : > { %880 = vmatmul.msk.bf16.gmra.mxu3 %vm268_vm3, %v248_v19 }
  0xe6   :  { %606 = vmatpush.bf16.msra.mxu3 (%p66_p0), %v1053_v3  ;;  %436 = vmatpush.bf16.msra.mxu0 (%p66_p0), %v1040_v4  ;;  %v1059_v3 = vld [vmem:[%s1385_s5 + $0xa0] sm:$0xff] (%p66_p0) }
  0xe8   :  { %493 = vmatpush.bf16.msra.mxu1 (%p66_p0), %v1044_v5 }
  0xea   :  { %607 = vmatpush.bf16.msra.mxu3 (%p66_p0), %v1052_v7 }
  0xef   : > { %878 = vmatmul.msk.bf16.gmra.mxu1 %vm268_vm3, %v246_v24 }
 0x13c   : > { %v296_v26 = vpop.f32.mrf.mxu1 }
 0x13d   : > { %v326_v27 = vadd.f32 %v296_v26, %v231_v25 }
 0x13f   : > { %338 = vst.msk [vmem:[#allocation2] sm:$0xff] %vm51_vm0, %v326_v27 }
 0x144   : > { %v298_v29 = vpop.f32.mrf.mxu1 }
 0x145   : > { %v327_v30 = vadd.f32 %v298_v29, %v232_v28 }
 0x146   :  { %v350_v8 = vld [vmem:[#allocation2] sm:$0xff] (%p66_p0) }
 0x147   : > { %339 = vst.msk [vmem:[#allocation2 + $0x8] sm:$0xff] %vm51_vm0, %v327_v30  ;;  %v362_v10 = vmax.f32 (%p66_p0), %v350_v8, 0.0  ;;  %v1039_v30 = vld [vmem:[%s1385_s5] sm:$0xff] (%p66_p0) }
 0x148   :  { %437 = vmatpush.bf16.msra.mxu0 (%p66_p0), %v1039_v30 }
 0x149   :  { %v374_v22 = vpack.c.bf16 (%p66_p0), %v362_v10, %v362_v10 }
 0x14c   : > { %v301_v32 = vpop.f32.mrf.mxu1 }
 0x14d   : > { %v328_v35 = vadd.f32 %v301_v32, %v233_v31  ;;  %v1043_v31 = vld [vmem:[%s1385_s5 + $0x20] sm:$0xff] (%p66_p0)  ;;  %v400_v32 = vunpack.c.l.b16 (%p66_p0), %v374_v22 }
 0x14e   :  { %v351_v9 = vld [vmem:[#allocation2 + $0x8] sm:$0xff] (%p66_p0)  ;;  %494 = vmatpush.bf16.msra.mxu1 (%p66_p0), %v1043_v31 }
 0x14f   : > { %340 = vst.msk [vmem:[#allocation2 + $0x10] sm:$0xff] %vm51_vm0, %v328_v35  ;;  %v363_v11 = vmax.f32 (%p66_p0), %v351_v9, 0.0 }
 0x151   :  { %v375_v23 = vpack.c.bf16 (%p66_p0), %v363_v11, %v363_v11 }
 0x153   :  { %v401_v35 = vunpack.c.l.b16 (%p66_p0), %v375_v23 }
 0x154   : > { %v303_v34 = vpop.f32.mrf.mxu1 }
 0x155   : > { %v329_v36 = vadd.f32 %v303_v34, %v234_v33 }
 0x156   :  { %v352_v12 = vld [vmem:[#allocation2 + $0x10] sm:$0xff] (%p66_p0) }
 0x157   : > { %341 = vst.msk [vmem:[#allocation2 + $0x18] sm:$0xff] %vm51_vm0, %v329_v36  ;;  %v364_v16 = vmax.f32 (%p66_p0), %v352_v12, 0.0  ;;  %v1047_v36 = vld [vmem:[%s1385_s5 + $0x40] sm:$0xff] (%p66_p0) }
 0x158   : > { %v316_v38 = vpop.f32.mrf.mxu3  ;;  %551 = vmatpush.bf16.msra.mxu2 (%p66_p0), %v1047_v36  ;;  %v1082_v12 = vld [vmem:[%s1386_s6] ss:$0 sm:$0xff] (%p66_p0) }
 0x159   : > { %v334_v39 = vadd.f32 %v316_v38, %v239_v37  ;;  %v376_v26 = vpack.c.bf16 (%p66_p0), %v364_v16, %v364_v16  ;;  %v1051_v37 = vld [vmem:[%s1385_s5 + $0x60] sm:$0xff] (%p66_p0) }
 0x15a   :  { %608 = vmatpush.bf16.msra.mxu3 (%p66_p0), %v1051_v37 }
 0x15b   : > { %346 = vst.msk [vmem:[#allocation2 + $0x40] sm:$0xff] %vm51_vm0, %v334_v39  ;;  %v457_v38 = vunpack.c.l.b16 (%p66_p0), %v376_v26 }
 0x15c   : > { %v306_v41 = vpop.f32.mrf.mxu1 }
 0x15d   : > { %v330_v42 = vadd.f32 %v306_v41, %v235_v40 }
 0x15e   :  { %v353_v13 = vld [vmem:[#allocation2 + $0x18] sm:$0xff] (%p66_p0) }
 0x15f   : > { %342 = vst.msk [vmem:[#allocation2 + $0x20] sm:$0xff] %vm51_vm0, %v330_v42  ;;  %v365_v17 = vmax.f32 (%p66_p0), %v353_v13, 0.0 }
 0x160   : > { %v318_v44 = vpop.f32.mrf.mxu3 }
 0x161   : > { %v335_v45 = vadd.f32 %v318_v44, %v240_v43  ;;  %v377_v27 = vpack.c.bf16 (%p66_p0), %v365_v17, %v365_v17  ;;  %v1058_v44 = vld [vmem:[%s1385_s5 + $0x98] sm:$0xff] (%p66_p0) }
 0x162   :  { %662 = vmatpush.bf16.msrb.mxu0 (%p66_p0), %v1058_v44 }
 0x163   : > { %347 = vst.msk [vmem:[#allocation2 + $0x48] sm:$0xff] %vm51_vm0, %v335_v45  ;;  %v458_v39 = vunpack.c.l.b16 (%p66_p0), %v377_v27  ;;  %v1062_v45 = vld [vmem:[%s1385_s5 + $0xb8] sm:$0xff] (%p66_p0) }
 0x164   : > { %v308_v47 = vpop.f32.mrf.mxu1  ;;  %719 = vmatpush.bf16.msrb.mxu1 (%p66_p0), %v1062_v45 }
 0x165   : > { %v331_v48 = vadd.f32 %v308_v47, %v236_v46  ;;  %v402_v46 = vpack.c.b16 (%p66_p0), %v401_v35, %v400_v32  ;;  %v459_v47 = vpack.c.b16 (%p66_p0), %v458_v39, %v457_v38  ;;  %v1099_v38 = vmov (%p66_p0), 50.0  }
 0x166   :  { %v354_v15 = vld [vmem:[#allocation2 + $0x20] sm:$0xff] (%p66_p0)  ;;  %1085 = vrcp.f32 (%p66_p0), %v1099_v38 }
 0x167   : > { %343 = vst.msk [vmem:[#allocation2 + $0x28] sm:$0xff] %vm51_vm0, %v331_v48  ;;  %v366_v19 = vmax.f32 (%p66_p0), %v354_v15, 0.0  ;;  %897 = vmatmul.msk.bf16.vlgmr.msra.gmra.mxu0 (%p66_p0), %vm51_vm0, %v402_v46  ;;  %922 = vmatmul.msk.bf16.vlgmr.msra.gmra.mxu1 (%p66_p0), %vm51_vm0, %v459_v47 }
 0x168   : > { %v321_v50 = vpop.f32.mrf.mxu3 }
 0x169   : > { %v336_v51 = vadd.f32 %v321_v50, %v241_v49  ;;  %v378_v28 = vpack.c.bf16 (%p66_p0), %v366_v19, %v366_v19  ;;  %v358_v49 = vld [vmem:[#allocation2 + $0x40] sm:$0xff] (%p66_p0) }
 0x16b   : > { %348 = vst.msk [vmem:[#allocation2 + $0x50] sm:$0xff] %vm51_vm0, %v336_v51  ;;  %v514_v40 = vunpack.c.l.b16 (%p66_p0), %v378_v28  ;;  %v359_v51 = vld [vmem:[#allocation2 + $0x48] sm:$0xff] (%p66_p0) }
 0x16c   : > { %v311_v53 = vpop.f32.mrf.mxu1  ;;  %v1086_v39 = vpop.eup (%p66_p0), %1085 }
 0x16d   : > { %v332_v54 = vadd.f32 %v311_v53, %v237_v52  ;;  %vm743_vm5 = vweird.f32 (%p66_p0), %v1086_v39 }
 0x16e   :  { %v355_v18 = vld [vmem:[#allocation2 + $0x28] sm:$0xff] (%p66_p0) }
 0x16f   : > { %344 = vst.msk [vmem:[#allocation2 + $0x30] sm:$0xff] %vm51_vm0, %v332_v54  ;;  %v367_v24 = vmax.f32 (%p66_p0), %v355_v18, 0.0 }
 0x170   : > { %v323_v56 = vpop.f32.mrf.mxu3 }
 0x171   : > { %v337_v57 = vadd.f32 %v323_v56, %v242_v55  ;;  %v379_v33 = vpack.c.bf16 (%p66_p0), %v367_v24, %v367_v24  ;;  %v1057_v55 = vld [vmem:[%s1385_s5 + $0x90] sm:$0xff] (%p66_p0) }
 0x172   :  { %v360_v52 = vld [vmem:[#allocation2 + $0x50] sm:$0xff] (%p66_p0)  ;;  %663 = vmatpush.bf16.msrb.mxu0 (%p66_p0), %v1057_v55 }
 0x173   : > { %349 = vst.msk [vmem:[#allocation2 + $0x58] sm:$0xff] %vm51_vm0, %v337_v57  ;;  %68 = sbr.rel (!%p66_p0) target bundleno = 19 (0x13), region = 70  ;;  %v515_v42 = vunpack.c.l.b16 (%p66_p0), %v379_v33  ;;  %v1061_v56 = vld [vmem:[%s1385_s5 + $0xb0] sm:$0xff] (%p66_p0)  ;;  %v370_v57 = vmax.f32 (%p66_p0), %v358_v49, 0.0 }
 0x174   : > { %v313_v59 = vpop.f32.mrf.mxu1  ;;  %720 = vmatpush.bf16.msrb.mxu1 (%p66_p0), %v1061_v56 }
 0x175   : > { %v333_v60 = vadd.f32 %v313_v59, %v238_v58  ;;  %v516_v50 = vpack.c.b16 (%p66_p0), %v515_v42, %v514_v40  ;;  %v371_v58 = vmax.f32 (%p66_p0), %v359_v51, 0.0  ;;  %v372_v59 = vmax.f32 (%p66_p0), %v360_v52, 0.0 }
 0x176   :  { %v356_v20 = vld [vmem:[#allocation2 + $0x30] sm:$0xff] (%p66_p0)  ;;  %v382_v63 = vpack.c.bf16 (%p66_p0), %v370_v57, %v370_v57  ;;  %664 = vmatpush.bf16.msrb.mxu0 (%p66_p0), %v1056_v61  ;;  %v739_v40 = vmul.f32 (%p66_p0), 50.0, %v1086_v39 }
 0x177   : > { %345 = vst.msk [vmem:[#allocation2 + $0x38] sm:$0xff] %vm51_vm0, %v333_v60  ;;  %v368_v25 = vmax.f32 (%p66_p0), %v356_v20, 0.0  ;;  %947 = vmatmul.msk.bf16.vlgmr.msra.gmra.mxu2 (%p66_p0), %vm51_vm0, %v516_v50  ;;  %v383_v14 = vpack.c.bf16 (%p66_p0), %v371_v58, %v371_v58  ;;  %v384_v0 = vpack.c.bf16 (%p66_p0), %v372_v59, %v372_v59 }
 0x178   :  { %721 = vmatpush.bf16.msrb.mxu1 %v1060_v62  ;;  %v628_v4 = vunpack.c.l.b16 %v382_v63 }
 0x179   :  { %v380_v34 = vpack.c.bf16 %v368_v25, %v368_v25  ;;  %v629_v5 = vunpack.c.l.b16 %v383_v14  ;;  %v685_v6 = vunpack.c.l.b16 %v384_v0 }
 0x17a   :  { %v361_v53 = vld [vmem:[#allocation2 + $0x58] sm:$0xff]  ;;  %665 = vmatpush.bf16.msrb.mxu0 %v1055_v2 }
 0x17b   :  { %v571_v43 = vunpack.c.l.b16 %v380_v34  ;;  %v373_v60 = vmax.f32 %v361_v53, 0.0  ;;  %v630_v8 = vpack.c.b16 %v629_v5, %v628_v4  ;;  %v1083_v4 = vld [vmem:[%s1387_s7] ss:$0 sm:$0xff] }
 0x17c   :  { %722 = vmatpush.bf16.msrb.mxu1 %v1059_v3 }
 0x17d   :  { %v385_v1 = vpack.c.bf16 %v373_v60, %v373_v60  ;;  %997 = vmatmul.msk.bf16.vlgmr.msrb.gmra.mxu0 %vm51_vm0, %v630_v8 }
 0x17e   :  { %v357_v21 = vld [vmem:[#allocation2 + $0x38] sm:$0xff] }
 0x17f   :  { %v369_v29 = vmax.f32 %v357_v21, 0.0  ;;  %v686_v7 = vunpack.c.l.b16 %v385_v1 }
 0x181   :  { %v381_v41 = vpack.c.bf16 %v369_v29, %v369_v29  ;;  %v687_v9 = vpack.c.b16 %v686_v7, %v685_v6  ;;  %v1084_v7 = vld [vmem:[%s1388_s8] ss:$0 sm:$0xff] }
 0x183   :  { %v572_v48 = vunpack.c.l.b16 %v381_v41  ;;  %1022 = vmatmul.msk.bf16.vlgmr.msrb.gmra.mxu1 %vm51_vm0, %v687_v9  ;;  %v740_v41 = vsub.f32 1.0, %v739_v40 }
 0x185   :  { %v573_v54 = vpack.c.b16 %v572_v48, %v571_v43  ;;  %v741_v42 = vmul.f32 %v1086_v39, %v740_v41 }
 0x187   :  { %972 = vmatmul.msk.bf16.vlgmr.msra.gmra.mxu3 %vm51_vm0, %v573_v54  ;;  %v742_v43 = vadd.f32 %v1086_v39, %v741_v42 }
 0x189   :  { %v744_v44 = vsel %vm743_vm5, %v1086_v39, %v742_v43 }
 0x1e4   :  { %v439_v10 = vpop.f32.mrf.mxu0  ;;  %v496_v11 = vpop.f32.mrf.mxu1 }
 0x1e5   :  { %v444_v13 = vadd.f32 %v1082_v12, %v439_v10 }
 0x1e7   :  { %v501_v18 = vadd.f32 %v496_v11, %v444_v13 }
 0x1ec   :  { %v441_v16 = vpop.f32.mrf.mxu0  ;;  %v498_v17 = vpop.f32.mrf.mxu1 }
 0x1ed   :  { %v445_v21 = vadd.f32 %v1082_v12, %v441_v16 }
 0x1ef   :  { %v502_v26 = vadd.f32 %v498_v17, %v445_v21 }
 0x1fa   :  { %v553_v15 = vpop.f32.mrf.mxu2  ;;  %v667_v24 = vpop.f32.mrf.mxu0 }
 0x1fb   :  { %v558_v19 = vadd.f32 %v553_v15, %v501_v18 }
 0x200   :  { %v724_v25 = vpop.f32.mrf.mxu1 }
 0x202   :  { %v555_v23 = vpop.f32.mrf.mxu2  ;;  %v669_v35 = vpop.f32.mrf.mxu0 }
 0x203   :  { %v559_v28 = vadd.f32 %v555_v23, %v502_v26 }
 0x208   :  { %v726_v34 = vpop.f32.mrf.mxu1 }
 0x20a   :  { %v610_v20 = vpop.f32.mrf.mxu3 }
 0x20b   :  { %v615_v22 = vadd.f32 %v610_v20, %v558_v19 }
 0x20d   :  { %v672_v27 = vadd.f32 %v667_v24, %v615_v22 }
 0x20f   :  { %v729_v29 = vadd.f32 %v724_v25, %v672_v27 }
 0x211   :  { %v732_v30 = vsel %vm731_vm4, %v729_v29, 0.0 }
 0x212   :  { %v612_v31 = vpop.f32.mrf.mxu3  ;;  %733 = vadd.xlane.f32.xlu0 %v732_v30 }
 0x213   :  { %v616_v32 = vadd.f32 %v612_v31, %v559_v28 }
 0x215   :  { %v673_v33 = vadd.f32 %v669_v35, %v616_v32 }
 0x217   :  { %v730_v36 = vadd.f32 %v726_v34, %v673_v33 }
 0x219   :  { %v735_v37 = vsel %vm731_vm4, %v730_v36, 0.0 }
 0x21a   :  { %736 = vadd.xlane.f32.xlu0 %v735_v37 }
 0x285   :  { %v734_v45 = vpop.xlane.xlu0 %733 }
 0x286   :  { %v745_v46 = vmul.f32 %v744_v44, %v734_v45 }
 0x288   :  { %v747_v47 = vsub.f32 %v729_v29, %v745_v46 }
 0x28a   :  { %v749_v48 = vmul.f32 %v747_v47, %v747_v47 }
 0x28c   :  { %v751_v49 = vsel %vm731_vm4, %v749_v48, 0.0 }
 0x28d   :  { %752 = vadd.xlane.f32.xlu1 %v751_v49  ;;  %v737_v50 = vpop.xlane.xlu0 %736 }
 0x28e   :  { %v746_v51 = vmul.f32 %v744_v44, %v737_v50 }
 0x290   :  { %v748_v52 = vsub.f32 %v730_v36, %v746_v51 }
 0x292   :  { %v750_v53 = vmul.f32 %v748_v52, %v748_v52 }
 0x294   :  { %v754_v54 = vsel %vm731_vm4, %v750_v53, 0.0 }
 0x295   :  { %755 = vadd.xlane.f32.xlu1 %v754_v54 }
 0x300   :  { %v753_v55 = vpop.xlane.xlu1 %752 }
 0x301   :  { %v757_v56 = vmul.f32 %v753_v55, %v744_v44 }
 0x303   :  { %v759_v57 = vadd.f32 1e-05, %v757_v56 }
 0x305   :  { %1087 = vrsqrt.f32 %v759_v57  ;;  %vm767_vm7 = vweird.f32 %v759_v57 }
 0x308   :  { %v756_v58 = vpop.xlane.xlu1 %755 }
 0x309   :  { %v758_v59 = vmul.f32 %v756_v58, %v744_v44 }
 0x30b   :  { %v1088_v60 = vpop.eup %1087  ;;  %v760_v61 = vadd.f32 1e-05, %v758_v59 }
 0x30c   :  { %v762_v62 = vmul.f32 %v1088_v60, %v759_v57  ;;  %vm768_vm6 = vweird.f32 %v1088_v60 }
 0x30d   :  { %1089 = vrsqrt.f32 %v760_v61  ;;  %vm769_vm8 = vmor %vm767_vm7, %vm768_vm6  ;;  %vm777_vm10 = vweird.f32 %v760_v61 }
 0x30e   :  { %v763_v63 = vmul.f32 %v1088_v60, %v762_v62 }
 0x310   :  { %v764_v14 = vmul.f32 0.5, %v763_v63 }
 0x312   :  { %v765_v0 = vsub.f32 1.5, %v764_v14 }
 0x313   :  { %v1090_v1 = vpop.eup %1089 }
 0x314   :  { %v766_v2 = vmul.f32 %v1088_v60, %v765_v0  ;;  %v772_v3 = vmul.f32 %v1090_v1, %v760_v61  ;;  %vm778_vm9 = vweird.f32 %v1090_v1 }
 0x315   :  { %vm779_vm11 = vmor %vm777_vm10, %vm778_vm9 }
 0x316   :  { %v770_v5 = vsel %vm769_vm8, %v1088_v60, %v766_v2  ;;  %v773_v6 = vmul.f32 %v1090_v1, %v772_v3 }
 0x317   :  { %v781_v8 = vmul.f32 %v770_v5, %v747_v47 }
 0x318   :  { %v774_v9 = vmul.f32 0.5, %v773_v6 }
 0x319   :  { %v787_v10 = vmul.f32 %v1083_v4, %v781_v8 }
 0x31a   :  { %v775_v11 = vsub.f32 1.5, %v774_v9 }
 0x31b   :  { %v793_v12 = vadd.f32 %v1084_v7, %v787_v10 }
 0x31c   :  { %v776_v13 = vmul.f32 %v1090_v1, %v775_v11 }
 0x31d   :  { %795 = vst.msk [vmem:[%s1389_s9] sm:$0xff] %vm731_vm4, %v793_v12 }
 0x31e   :  { %v780_v15 = vsel %vm779_vm11, %v1090_v1, %v776_v13 }
 0x31f   :  { %v782_v16 = vmul.f32 %v780_v15, %v748_v52 }
 0x321   :  { %v788_v17 = vmul.f32 %v1083_v4, %v782_v16 }
 0x323   :  { %v794_v18 = vadd.f32 %v1084_v7, %v788_v17 }
 0x325   :  { %796 = vst.msk [vmem:[%s1389_s9 + $0x8] sm:$0xff] %vm731_vm4, %v794_v18 }

</bundles_post_ra>
